<compile_context>
chip_gen: v7x
topology: tpu7x:2x2x1
jax: 0.10.0
libtpu: 0.0.40
codegen_flags: <defaults>
</compile_context>

<pallas_src>
import jax
import jax.numpy as jnp
from jax.experimental import pallas as pl
from jax.experimental.pallas import tpu as pltpu


def _soft_clamp5_kernel(x_ref, o_ref):
    x = x_ref[...]
    if x.dtype in (jnp.float32, jnp.bfloat16):
        # bf16/f32 tanh lands on the EUP directly; |5*tanh(x/5)| <= 5 so no
        # precision concern for the output dtype.
        y = jnp.tanh(x * jnp.asarray(1.0 / 5.0, x.dtype)) * jnp.asarray(5.0, x.dtype)
    else:
        xf = x.astype(jnp.float32)
        y = jnp.tanh(xf * (1.0 / 5.0)) * 5.0
    o_ref[...] = y.astype(o_ref.dtype)


def _round_up(v, m):
    return ((v + m - 1) // m) * m


def _pick_row_tile(rows, cols, itemsize, target_block_bytes):
    """Largest multiple-of-8 row tile with block <= target bytes, grid >= 2 when possible."""
    if rows <= 8:
        return rows  # block sublane dim == full dim (allowed), tiny input
    tr = max(8, ((target_block_bytes // (cols * itemsize)) // 8) * 8)
    # Keep at least 2 grid steps so both v7x TensorCores get work.
    tr = min(tr, _round_up(pl.cdiv(rows, 2), 8))
    tr = min(tr, _round_up(rows, 8))
    return max(8, tr)


def _run(x2d, tr, dtype):
    rows, cols = x2d.shape
    itemsize = jnp.dtype(dtype).itemsize
    grid_len = pl.cdiv(rows, tr)
    return pl.pallas_call(
        _soft_clamp5_kernel,
        out_shape=jax.ShapeDtypeStruct((rows, cols), dtype),
        grid_spec=pltpu.PrefetchScalarGridSpec(
            num_scalar_prefetch=0,
            grid=(grid_len,),
            in_specs=[pl.BlockSpec((tr, cols), lambda i: (i, 0))],
            out_specs=pl.BlockSpec((tr, cols), lambda i: (i, 0)),
        ),
        compiler_params=pltpu.CompilerParams(
            dimension_semantics=("parallel",)
        ),
        cost_estimate=pl.CostEstimate(
            flops=0,
            transcendentals=rows * cols,
            bytes_accessed=2 * rows * cols * itemsize,
        ),
    )(x2d)


def soft_clamp5(x, *, target_block_bytes=2 * 1024 * 1024):
    """Elementwise 5*tanh(x/5) on an arbitrary-shaped array (NCHW or other)."""
    orig_shape = x.shape
    dtype = x.dtype
    n = int(x.size)
    if n == 0:
        return x
    itemsize = jnp.dtype(dtype).itemsize

    # --- pick a lane-dense cols that divides n exactly (zero-copy fast path) ---
    candidates = (2048, 1024, 512, 256, 128)
    cols = 0
    for c in candidates:  # prefer shapes with >= 8 rows (full sublanes)
        if n % c == 0 and n // c >= 8:
            cols = c
            break
    if cols == 0:
        for c in candidates:
            if n % c == 0:
                cols = c
                break

    if cols:
        # Fast path: pure reshape in/out, no pad, no slice.
        rows = n // cols
        x2d = x.reshape(rows, cols)
        tr = _pick_row_tile(rows, cols, itemsize, target_block_bytes)
        out2d = _run(x2d, tr, dtype)
        return out2d.reshape(orig_shape)

    # Ragged fallback (n not a multiple of 128): minimal pad to a lane-dense slab.
    cols = 512
    padded = _round_up(n, cols)
    rows = padded // cols
    flat = jnp.pad(x.reshape(-1), (0, padded - n))
    x2d = flat.reshape(rows, cols)
    tr = _pick_row_tile(rows, cols, itemsize, target_block_bytes)
    out2d = _run(x2d, tr, dtype)
    return out2d.reshape(-1)[:n].reshape(orig_shape)


if __name__ == "__main__":
    key = jax.random.PRNGKey(0)
    # Small NCHW input consistent with the module's elementwise forward.
    x = jax.random.normal(key, (2, 4, 16, 16), dtype=jnp.float32) * 10.0

    y = soft_clamp5(x)
    y = jax.block_until_ready(y)

    # Reference check against plain JAX.
    y_ref = jnp.tanh(x / 5.0) * 5.0
    assert y.shape == x.shape and y.dtype == x.dtype
    assert jnp.max(jnp.abs(y - y_ref)) < 1e-5

    # Also exercise a ragged (non-multiple-of-128) size to cover the fallback path.
    x2 = jax.random.normal(jax.random.PRNGKey(1), (3, 5, 7), dtype=jnp.float32) * 10.0
    y2 = jax.block_until_ready(soft_clamp5(x2))
    assert jnp.max(jnp.abs(y2 - jnp.tanh(x2 / 5.0) * 5.0)) < 1e-5

    print("KERNEL_OK")
</pallas_src>

<mosaic_0001>
module attributes {stable_mosaic.version = 11 : i64} {
  func.func @_soft_clamp5_kernel(%arg0: i32, %arg1: memref<8x256xf32, #tpu.memory_space<vmem>>, %arg2: memref<8x256xf32, #tpu.memory_space<vmem>>) attributes {dimension_semantics = [#tpu.dimension_semantics<parallel>], iteration_bounds = array<i64: 1>, scalar_prefetch = 0 : i64, scratch_operands = 0 : i64, tpu.core_type = #tpu.core_type<tc>, window_params = [{transform_indices = @transform_0, window_bounds = array<i64: 8, 256>}, {transform_indices = @transform_1, window_bounds = array<i64: 8, 256>}]} {
    %c0 = arith.constant 0 : index
    %c0_0 = arith.constant 0 : index
    %0 = vector.load %arg1[%c0, %c0_0] : memref<8x256xf32, #tpu.memory_space<vmem>>, vector<8x256xf32>
    %cst = arith.constant 2.000000e-01 : f32
    %1 = vector.broadcast %cst : f32 to vector<8x256xf32>
    %2 = arith.mulf %0, %1 : vector<8x256xf32>
    %3 = math.tanh %2 : vector<8x256xf32>
    %cst_1 = arith.constant 5.000000e+00 : f32
    %4 = vector.broadcast %cst_1 : f32 to vector<8x256xf32>
    %5 = arith.mulf %3, %4 : vector<8x256xf32>
    %c0_2 = arith.constant 0 : index
    %c0_3 = arith.constant 0 : index
    %6 = vector.load %arg2[%c0_2, %c0_3] : memref<8x256xf32, #tpu.memory_space<vmem>>, vector<8x256xf32>
    tpu.vector_store %arg2[%c0_2, %c0_3], %5 {strides = array<i32>} : memref<8x256xf32, #tpu.memory_space<vmem>>, vector<8x256xf32>,
    return
  }
  func.func @transform_0(%arg0: i32) -> (i32, i32) {
    %c0_i32 = arith.constant 0 : i32
    %c0_i32_0 = arith.constant 0 : i32
    return %arg0, %c0_i32 : i32, i32
  }
  func.func @transform_1(%arg0: i32) -> (i32, i32) {
    %c0_i32 = arith.constant 0 : i32
    %c0_i32_0 = arith.constant 0 : i32
    return %arg0, %c0_i32 : i32, i32
  }
}

</mosaic_0001>

<bundles_post_ra>
// kernel: tpu_custom_call.1
= control target key start
LH: loop header
LB: loop body
LE: loop exit
PB: predicated region body
PF: predicated region fallthrough
CT: control target
= control target key end

     0   :  { %6 = vsyncpa [#allocation3], 0  ;;  %s136_s0 = inlined_call_operand.hbm [shape: f32[8,256], index: 0, kind: input, shape index: {}]   ;;  %s137_s1 = inlined_call_operand.hbm [shape: f32[8,256], index: 1, kind: output, shape index: {}]  }
   0x1   :  { %7 = vsyncpa [#allocation4], 0  ;;  %s100_s6 = smov [#allocation2]   ;;  %s52_s10 = scalar_lea.hbm %s136_s0, 256 }
   0x2   :  { %s14_s7 = sshll.u32 %s100_s6, 4  ;;  %p53_p0 = scmp.ne.s32.totalorder %s136_s0, %s52_s10  ;;  %s15_s7 = int_to_ptr.vmem [resolvable:$true] %s14_s7 }
   0x3   :  { %p56_p1 = scmp.lt.u32.totalorder %s52_s10, %s136_s0 }
   0x5   :  { %p58_p2 = pnand %p56_p1, %p53_p0 }
   0x7   :  { %61 = shalt.err (!%p58_p2)
}
   0x8   :  { %s62_s15 = scalar_lea.vmem %s15_s7, 256  ;;  %p67_p4 = scmp.lt.s32.totalorder %s15_s7, %s15_s7 }
   0x9   :  { %p63_p3 = scmp.ne.s32.totalorder %s15_s7, %s62_s15  ;;  %p68_p5 = scmp.lt.s32.totalorder %s62_s15, %s62_s15 }
   0xb   :  { %p69_p6 = por %p68_p5, %p67_p4 }
   0xd   :  { %p70_p7 = pnand %p69_p6, %p63_p3 }
   0xf   :  { %73 = shalt.err (!%p70_p7)
}
  0x10   :  { %17 = dma.hbm_to_vmem [thread:$0]  %s136_s0, 256, %s15_s7, [#allocation3]  }
  0x11   :  { %96 = dma.done.wait [#allocation3], 256  }
  0x12   :  { %97 = vsyncadd [#allocation3], 4294967040  ;;  %v21_v0 = vld [vmem:[#allocation2] sm:$0xff]  ;;  %v22_v1 = vld [vmem:[#allocation2 + $0x8] sm:$0xff]  ;;  %s101_s18 = smov [#allocation5]  }
  0x13   :  { %v23_v2 = vmul.f32 0.2, %v21_v0  ;;  %v24_v3 = vmul.f32 0.2, %v22_v1  ;;  %s37_s19 = sshll.u32 %s101_s18, 4  ;;  %s38_s19 = int_to_ptr.vmem [resolvable:$true] %s37_s19 }
  0x14   :  { %s74_s20 = scalar_lea.vmem %s38_s19, 256  ;;  %p79_p9 = scmp.lt.s32.totalorder %s38_s19, %s38_s19 }
  0x15   :  { %48 = vtanh.f32 %v23_v2  ;;  %p75_p8 = scmp.ne.s32.totalorder %s38_s19, %s74_s20  ;;  %p80_p10 = scmp.lt.s32.totalorder %s74_s20, %s74_s20 }
  0x16   :  { %50 = vtanh.f32 %v24_v3 }
  0x17   :  { %p81_p11 = por %p80_p10, %p79_p9 }
  0x19   :  { %p82_p12 = pnand %p81_p11, %p75_p8 }
  0x1f   :  { %v49_v4 = vpop.eup %48 }
  0x20   :  { %v51_v5 = vpop.eup %50  ;;  %v27_v6 = vmul.f32 5.0, %v49_v4 }
  0x21   :  { %v28_v7 = vmul.f32 5.0, %v51_v5 }
  0x22   :  { %29 = vst [vmem:[#allocation5] sm:$0xff] %v27_v6 }
  0x23   :  { %30 = vst [vmem:[#allocation5 + $0x8] sm:$0xff] %v28_v7 }
  0x24   :  { %85 = shalt.err (!%p82_p12)
}
  0x25   :  { %s86_s22 = scalar_lea.hbm %s137_s1, 256 }
  0x26   :  { %p87_p13 = scmp.ne.s32.totalorder %s137_s1, %s86_s22  ;;  %p90_p0 = scmp.lt.u32.totalorder %s86_s22, %s137_s1 }
  0x28   :  { %p92_p1 = pnand %p90_p0, %p87_p13 }
  0x2a   :  { %95 = shalt.err (!%p92_p1)
}
  0x2b   :  { %40 = dma.vmem_to_hbm [thread:$0]  %s38_s19, 256, %s137_s1, [#allocation4]  }
  0x2c   :  { %98 = dma.done.wait [#allocation4], 256  }
  0x2d   :  { %99 = vsyncadd [#allocation4], 4294967040 }
  0x2e   :  { %44 = vsyncpa [#allocation3], 1 }
  0x2f   :  { %45 = vsyncpa [#allocation4], 1 }

</bundles_post_ra>
